<compile_context>
chip_gen: v6e
topology: v6e:2x2x1
jax: 0.10.0
libtpu: 0.0.40
codegen_flags: <defaults>
</compile_context>

<pallas_src>
import functools

import jax
import jax.numpy as jnp
from jax.experimental import pallas as pl
from jax.experimental.pallas import tpu as pltpu


# ---------------------------------------------------------------------------
# Generation-aware VMEM budgeting
# ---------------------------------------------------------------------------
def _vmem_capacity_bytes():
    try:
        return int(pltpu.get_tpu_info().vmem_capacity_bytes)
    except Exception:
        return 64 << 20  # conservative fallback: v7x per-TensorCore VMEM


_VMEM_CAP = _vmem_capacity_bytes()


def _block_bytes(tile, kblk, h, h2):
    # double-buffered bf16 x block + double-buffered bf16 out block + f32 acc scratch
    return 2 * kblk * tile * h * 2 + 2 * tile * h2 * 2 + tile * h2 * 4


def _pick_tile(g, h, h2, kblk):
    """Largest power-of-two tile (>=8) whose per-step blocks fit the generation-aware
    budget while keeping >=4 steps on the parallel axis whenever G allows (v7x megacore:
    2 TensorCores x >=2 pipelined steps each)."""
    budget = min(_VMEM_CAP // 4, 32 << 20)          # 16 MiB on v7x, 32 MiB on v5e/v6e
    t = 4096 if _VMEM_CAP >= (96 << 20) else 2048   # larger ceiling on 128 MiB parts
    while t > 8 and _block_bytes(t, kblk, h, h2) > budget:
        t //= 2
    while t > 8 and 4 * t > g:
        t //= 2
    return t


def _vmem_limit_bytes(tile, kblk, h, h2):
    weights = 2 * (h * h2 * 2 + h2 * 4)             # double-buffered W2 (bf16) + b2 (f32)
    ws = _block_bytes(tile, kblk, h, h2) + weights
    limit = min(ws + (8 << 20), int(_VMEM_CAP * 0.7))   # <=~44 MiB on v7x, plenty on v5e/v6e
    return int(max(limit, 16 << 20))


# ---------------------------------------------------------------------------
# Pallas kernel: layer-2 matmul -> running max over K neighbors (K on the grid)
#   x_ref:  (kblk, tile, H) bf16, already ReLU'd layer-1 activations
#   acc_ref: (tile, h2) f32 resident accumulator (scratch)
#   o_ref:  (tile, h2) bf16, written once on the last k step (bias fused there)
# ---------------------------------------------------------------------------
def _mlp2_max_kernel(x_ref, w2_ref, b2_ref, o_ref, acc_ref):
    k = pl.program_id(1)
    w2 = w2_ref[...]                                              # (H, h2) bf16, hoisted
    y = jnp.dot(x_ref[0], w2, preferred_element_type=jnp.float32)
    for j in range(1, x_ref.shape[0]):                            # kblk is 1 or 2 (static)
        y = jnp.maximum(y, jnp.dot(x_ref[j], w2, preferred_element_type=jnp.float32))

    @pl.when(k == 0)
    def _():
        acc_ref[...] = y

    @pl.when(k != 0)
    def _():
        acc_ref[...] = jnp.maximum(acc_ref[...], y)

    @pl.when(k == pl.num_programs(1) - 1)
    def _():
        # bias is max-invariant -> add once; cast to bf16 on the single output store
        o_ref[...] = (acc_ref[...] + b2_ref[...]).astype(o_ref.dtype)


def grouped_linear_max(x, w2, b2):
    """x: (K, G, H) ReLU'd layer-1 activations -> (G, h2) bf16 of max_k x[k] @ W2 + b2."""
    ns, g, h = x.shape
    h2 = w2.shape[1]
    kblk = 2 if ns % 2 == 0 else 1
    tile = _pick_tile(g, h, h2, kblk)
    gp = pl.cdiv(g, tile) * tile
    if gp != g:  # padded groups are zeros -> produce b2 rows, sliced off below
        x = jnp.pad(x, ((0, 0), (0, gp - g), (0, 0)))

    out = pl.pallas_call(
        _mlp2_max_kernel,
        out_shape=jax.ShapeDtypeStruct((gp, h2), jnp.bfloat16),
        grid=(gp // tile, ns // kblk),
        in_specs=[
            pl.BlockSpec((kblk, tile, h), lambda i, k: (k, i, 0)),   # lane-dense: h = full dim
            pl.BlockSpec((h, h2), lambda i, k: (0, 0)),
            pl.BlockSpec((1, h2), lambda i, k: (0, 0)),
        ],
        out_specs=pl.BlockSpec((tile, h2), lambda i, k: (i, 0)),
        scratch_shapes=[pltpu.VMEM((tile, h2), jnp.float32)],
        compiler_params=pltpu.CompilerParams(
            dimension_semantics=("parallel", "arbitrary"),
            vmem_limit_bytes=_vmem_limit_bytes(tile, kblk, h, h2),
        ),
    )(x.astype(jnp.bfloat16), w2.astype(jnp.bfloat16), b2.astype(jnp.float32))
    return out[:g]


# ---------------------------------------------------------------------------
# Plain-JAX glue: FPS, kNN, gather
# TODO(synk): furthest-point-sampling and k-NN selection are sequential / index-driven and
# stay in plain JAX (lax loops / top_k / take_along_axis) — no clean Pallas tile form.
# ---------------------------------------------------------------------------
def square_distance(src, dst):
    # src: (B, S, 3), dst: (B, N, 3) -> (B, S, N)
    d = -2.0 * jnp.einsum("bsc,bnc->bsn", src, dst)
    d = d + jnp.sum(src * src, -1)[:, :, None]
    d = d + jnp.sum(dst * dst, -1)[:, None, :]
    return d


def furthest_point_sample(xyz_t, npoint):
    # xyz_t: (B, N, 3) -> (B, npoint) int32; seeded with index 0 like the CUDA reference
    b, n, _ = xyz_t.shape

    def body(i, state):
        idxs, dists, farthest = state
        idxs = idxs.at[:, i].set(farthest)
        centroid = jnp.take_along_axis(xyz_t, farthest[:, None, None], axis=1)  # (B,1,3)
        d = jnp.sum((xyz_t - centroid) ** 2, axis=-1)                           # (B,N)
        dists = jnp.minimum(dists, d)
        farthest = jnp.argmax(dists, axis=-1).astype(jnp.int32)
        return idxs, dists, farthest

    init = (
        jnp.zeros((b, npoint), dtype=jnp.int32),
        jnp.full((b, n), 1e10, dtype=jnp.float32),
        jnp.zeros((b,), dtype=jnp.int32),
    )
    idxs, _, _ = jax.lax.fori_loop(0, npoint, body, init)
    return idxs


# ---------------------------------------------------------------------------
# SA modules
# ---------------------------------------------------------------------------
def sa_module_knn(xyz, points, npoint, nsample, w1, b1, w2, b2):
    """PointNet_SA_Module_KNN (group_all=False, if_bn=False, use_xyz=True).
    Shared MLP: conv1 + ReLU -> conv2 (no activation) -> max over K neighbors."""
    b = xyz.shape[0]
    xyz_t = jnp.transpose(xyz, (0, 2, 1)).astype(jnp.float32)          # (B, N, 3)
    pts_t = jnp.transpose(points, (0, 2, 1)).astype(jnp.float32)       # (B, N, C)
    h1 = w1.shape[1]

    fps_idx = furthest_point_sample(xyz_t, npoint)                     # (B, S)
    new_xyz = jnp.take_along_axis(xyz, fps_idx[:, None, :], axis=2)    # (B, 3, S)
    new_xyz_t = jnp.transpose(new_xyz, (0, 2, 1))                      # (B, S, 3)

    sqr = square_distance(new_xyz_t, xyz_t)                            # (B, S, N)
    _, knn_idx = jax.lax.top_k(-sqr, nsample)                          # (B, S, K)

    # Layer-1 once per source point (XLA); centering folded into a per-group offset.
    p_all = jnp.concatenate([xyz_t, pts_t], axis=-1) @ w1              # (B, N, h1)
    off = b1 - new_xyz_t @ w1[:3]                                      # (B, S, h1)

    s, k = npoint, nsample
    p_gathered = jnp.take_along_axis(p_all, knn_idx.reshape(b, s * k, 1), axis=1)
    x_pre = p_gathered.reshape(b, s, k, h1) + off[:, :, None, :]       # (B, S, K, h1)
    x_pre = jnp.maximum(x_pre, 0.0)                                    # layer-1 ReLU, hoisted
    x_pre = jnp.transpose(x_pre, (2, 0, 1, 3)).reshape(k, b * s, h1)   # (K, G, h1)
    x_pre = x_pre.astype(jnp.bfloat16)                                 # halve kernel DMA bytes

    feat = grouped_linear_max(x_pre, w2, b2)                           # (G, h2) bf16
    new_feat = jnp.transpose(feat.reshape(b, s, -1), (0, 2, 1))        # (B, h2, S)
    return new_xyz, new_feat, knn_idx


def sa_module_group_all(xyz, points, w1, b1, w2, b2):
    """PointNet_SA_Module_KNN (group_all=True, use_xyz=True).
    Kept in plain XLA: G = B and a 1-step grid make a Pallas launch pure overhead here."""
    x = jnp.concatenate([xyz, points.astype(xyz.dtype)], axis=1)           # (B, 3+C, N)
    x = jnp.transpose(x, (0, 2, 1))                                        # (B, N, 3+C)
    h = jnp.maximum(x @ w1 + b1, 0.0)
    y = h @ w2 + b2
    return jnp.max(y, axis=1)[:, :, None]                                  # (B, out_dim, 1)


def feature_extractor_forward(point_cloud, params, npoint1, npoint2, nsample):
    l0_xyz = point_cloud
    l0_points = point_cloud
    l1_xyz, l1_points, _ = sa_module_knn(l0_xyz, l0_points, npoint1, nsample, *params["sa1"])
    l2_xyz, l2_points, _ = sa_module_knn(l1_xyz, l1_points, npoint2, nsample, *params["sa2"])
    l3_points = sa_module_group_all(l2_xyz, l2_points, *params["sa3"])
    return l3_points


# ---------------------------------------------------------------------------
# Deterministic parameter init (Conv2d 1x1 == dense: weight (C_in, C_out), bias (1, C_out))
# ---------------------------------------------------------------------------
def _init_linear(key, cin, cout):
    k1, k2 = jax.random.split(key)
    bound = 1.0 / float(cin) ** 0.5
    w = jax.random.uniform(k1, (cin, cout), jnp.float32, -bound, bound)
    b = jax.random.uniform(k2, (1, cout), jnp.float32, -bound, bound)
    return w, b


if __name__ == "__main__":
    B, N = 2, 256
    npoint1, npoint2, nsample = 128, 32, 16   # scaled-down spatial config (orig: 512, 128, 16)
    out_dim = 256

    key = jax.random.PRNGKey(0)
    k_pc, k1, k2, k3, k4, k5, k6 = jax.random.split(key, 7)
    point_cloud = jax.random.normal(k_pc, (B, 3, N), dtype=jnp.float32)

    params = {
        # sa1: in 3(+3 xyz)=6 -> [64, 128]
        "sa1": (*_init_linear(k1, 6, 64), *_init_linear(k2, 64, 128)),
        # sa2: in 128(+3)=131 -> [128, 256]
        "sa2": (*_init_linear(k3, 131, 128), *_init_linear(k4, 128, 256)),
        # sa3: in 256(+3)=259 -> [512, out_dim]
        "sa3": (*_init_linear(k5, 259, 512), *_init_linear(k6, 512, out_dim)),
    }

    fwd = jax.jit(functools.partial(
        feature_extractor_forward, npoint1=npoint1, npoint2=npoint2, nsample=nsample))
    out = jax.block_until_ready(fwd(point_cloud, params))

    assert out.shape == (B, out_dim, 1), out.shape
    assert bool(jnp.all(jnp.isfinite(out)))
    print("KERNEL_OK")
</pallas_src>

<mosaic_0001>
module attributes {stable_mosaic.version = 11 : i64} {
  func.func @_mlp2_max_kernel(%arg0: i32, %arg1: i32, %arg2: memref<2x64x64xbf16, #tpu.memory_space<vmem>>, %arg3: memref<64x128xbf16, #tpu.memory_space<vmem>>, %arg4: memref<1x128xf32, #tpu.memory_space<vmem>>, %arg5: memref<64x128xbf16, #tpu.memory_space<vmem>>, %arg6: memref<64x128xf32, #tpu.memory_space<vmem>>) attributes {dimension_semantics = [#tpu.dimension_semantics<parallel>, #tpu.dimension_semantics<arbitrary>], iteration_bounds = array<i64: 4, 8>, scalar_prefetch = 0 : i64, scratch_operands = 1 : i64, tpu.core_type = #tpu.core_type<tc>, window_params = [{transform_indices = @transform_0, window_bounds = array<i64: 2, 64, 64>}, {pipeline_mode = #tpu.pipeline_mode<synchronous>, transform_indices = @transform_1, window_bounds = array<i64: 64, 128>}, {pipeline_mode = #tpu.pipeline_mode<synchronous>, transform_indices = @transform_2, window_bounds = array<i64: 1, 128>}, {transform_indices = @transform_3, window_bounds = array<i64: 64, 128>}]} {
    %c0 = arith.constant 0 : index
    %c0_0 = arith.constant 0 : index
    %0 = vector.load %arg3[%c0, %c0_0] : memref<64x128xbf16, #tpu.memory_space<vmem>>, vector<64x128xbf16>
    %c0_1 = arith.constant 0 : index
    %c0_2 = arith.constant 0 : index
    %c0_3 = arith.constant 0 : index
    %1 = vector.load %arg2[%c0_1, %c0_2, %c0_3] : memref<2x64x64xbf16, #tpu.memory_space<vmem>>, vector<1x64x64xbf16>
    %2 = vector.shape_cast %1 : vector<1x64x64xbf16> to vector<64x64xbf16>
    %cst = arith.constant dense<0.000000e+00> : vector<64x128xf32>
    %3 = tpu.matmul %2, %0, %cst {dimension_numbers = #tpu.dot_dimension_numbers<[1], [0], [0], [1], [0, 0, 1, 1], [], []>} : vector<64x64xbf16>, vector<64x128xbf16>, vector<64x128xf32> -> vector<64x128xf32>
    %c1 = arith.constant 1 : index
    %c0_4 = arith.constant 0 : index
    %c0_5 = arith.constant 0 : index
    %4 = vector.load %arg2[%c1, %c0_4, %c0_5] : memref<2x64x64xbf16, #tpu.memory_space<vmem>>, vector<1x64x64xbf16>
    %5 = vector.shape_cast %4 : vector<1x64x64xbf16> to vector<64x64xbf16>
    %cst_6 = arith.constant dense<0.000000e+00> : vector<64x128xf32>
    %6 = tpu.matmul %5, %0, %cst_6 {dimension_numbers = #tpu.dot_dimension_numbers<[1], [0], [0], [1], [0, 0, 1, 1], [], []>} : vector<64x64xbf16>, vector<64x128xbf16>, vector<64x128xf32> -> vector<64x128xf32>
    %7 = arith.maximumf %3, %6 : vector<64x128xf32>
    %c0_i32 = arith.constant 0 : i32
    %8 = arith.cmpi eq, %arg1, %c0_i32 : i32
    %9 = arith.extui %8 : i1 to i32
    %c0_i32_7 = arith.constant 0 : i32
    %10 = arith.cmpi ne, %9, %c0_i32_7 : i32
    scf.if %10 {
      %c0_11 = arith.constant 0 : index
      %c0_12 = arith.constant 0 : index
      %17 = vector.load %arg6[%c0_11, %c0_12] : memref<64x128xf32, #tpu.memory_space<vmem>>, vector<64x128xf32>
      tpu.vector_store %arg6[%c0_11, %c0_12], %7 {strides = array<i32>} : memref<64x128xf32, #tpu.memory_space<vmem>>, vector<64x128xf32>,
    } else {
    }
    %c0_i32_8 = arith.constant 0 : i32
    %11 = arith.cmpi ne, %arg1, %c0_i32_8 : i32
    %12 = arith.extui %11 : i1 to i32
    %c0_i32_9 = arith.constant 0 : i32
    %13 = arith.cmpi ne, %12, %c0_i32_9 : i32
    scf.if %13 {
      %c0_11 = arith.constant 0 : index
      %c0_12 = arith.constant 0 : index
      %17 = vector.load %arg6[%c0_11, %c0_12] : memref<64x128xf32, #tpu.memory_space<vmem>>, vector<64x128xf32>
      %18 = arith.maximumf %17, %7 : vector<64x128xf32>
      %c0_13 = arith.constant 0 : index
      %c0_14 = arith.constant 0 : index
      %19 = vector.load %arg6[%c0_13, %c0_14] : memref<64x128xf32, #tpu.memory_space<vmem>>, vector<64x128xf32>
      tpu.vector_store %arg6[%c0_13, %c0_14], %18 {strides = array<i32>} : memref<64x128xf32, #tpu.memory_space<vmem>>, vector<64x128xf32>,
    } else {
    }
    %c7_i32 = arith.constant 7 : i32
    %14 = arith.cmpi eq, %arg1, %c7_i32 : i32
    %15 = arith.extui %14 : i1 to i32
    %c0_i32_10 = arith.constant 0 : i32
    %16 = arith.cmpi ne, %15, %c0_i32_10 : i32
    scf.if %16 {
      %c0_11 = arith.constant 0 : index
      %c0_12 = arith.constant 0 : index
      %17 = vector.load %arg6[%c0_11, %c0_12] : memref<64x128xf32, #tpu.memory_space<vmem>>, vector<64x128xf32>
      %c0_13 = arith.constant 0 : index
      %c0_14 = arith.constant 0 : index
      %18 = vector.load %arg4[%c0_13, %c0_14] : memref<1x128xf32, #tpu.memory_space<vmem>>, vector<1x128xf32>
      %19 = vector.broadcast %18 : vector<1x128xf32> to vector<64x128xf32>
      %20 = arith.addf %17, %19 : vector<64x128xf32>
      %21 = arith.truncf %20 : vector<64x128xf32> to vector<64x128xbf16>
      %c0_15 = arith.constant 0 : index
      %c0_16 = arith.constant 0 : index
      %22 = vector.load %arg5[%c0_15, %c0_16] : memref<64x128xbf16, #tpu.memory_space<vmem>>, vector<64x128xbf16>
      tpu.vector_store %arg5[%c0_15, %c0_16], %21 {strides = array<i32>} : memref<64x128xbf16, #tpu.memory_space<vmem>>, vector<64x128xbf16>,
    } else {
    }
    return
  }
  func.func @transform_0(%arg0: i32, %arg1: i32) -> (i32, i32, i32) {
    %c0_i32 = arith.constant 0 : i32
    %c0_i32_0 = arith.constant 0 : i32
    return %arg1, %arg0, %c0_i32 : i32, i32, i32
  }
  func.func @transform_1(%arg0: i32, %arg1: i32) -> (i32, i32) {
    %c0_i32 = arith.constant 0 : i32
    %c0_i32_0 = arith.constant 0 : i32
    %c0_i32_1 = arith.constant 0 : i32
    return %c0_i32, %c0_i32_0 : i32, i32
  }
  func.func @transform_2(%arg0: i32, %arg1: i32) -> (i32, i32) {
    %c0_i32 = arith.constant 0 : i32
    %c0_i32_0 = arith.constant 0 : i32
    %c0_i32_1 = arith.constant 0 : i32
    return %c0_i32, %c0_i32_0 : i32, i32
  }
  func.func @transform_3(%arg0: i32, %arg1: i32) -> (i32, i32) {
    %c0_i32 = arith.constant 0 : i32
    %c0_i32_0 = arith.constant 0 : i32
    return %arg0, %c0_i32 : i32, i32
  }
}

module attributes {stable_mosaic.version = 11 : i64} {
  func.func @_mlp2_max_kernel(%arg0: i32, %arg1: i32, %arg2: memref<2x16x128xbf16, #tpu.memory_space<vmem>>, %arg3: memref<128x256xbf16, #tpu.memory_space<vmem>>, %arg4: memref<1x256xf32, #tpu.memory_space<vmem>>, %arg5: memref<16x256xbf16, #tpu.memory_space<vmem>>, %arg6: memref<16x256xf32, #tpu.memory_space<vmem>>) attributes {dimension_semantics = [#tpu.dimension_semantics<parallel>, #tpu.dimension_semantics<arbitrary>], iteration_bounds = array<i64: 4, 8>, scalar_prefetch = 0 : i64, scratch_operands = 1 : i64, tpu.core_type = #tpu.core_type<tc>, window_params = [{transform_indices = @transform_0, window_bounds = array<i64: 2, 16, 128>}, {pipeline_mode = #tpu.pipeline_mode<synchronous>, transform_indices = @transform_1, window_bounds = array<i64: 128, 256>}, {pipeline_mode = #tpu.pipeline_mode<synchronous>, transform_indices = @transform_2, window_bounds = array<i64: 1, 256>}, {transform_indices = @transform_3, window_bounds = array<i64: 16, 256>}]} {
    %c0 = arith.constant 0 : index
    %c0_0 = arith.constant 0 : index
    %0 = vector.load %arg3[%c0, %c0_0] : memref<128x256xbf16, #tpu.memory_space<vmem>>, vector<128x256xbf16>
    %c0_1 = arith.constant 0 : index
    %c0_2 = arith.constant 0 : index
    %c0_3 = arith.constant 0 : index
    %1 = vector.load %arg2[%c0_1, %c0_2, %c0_3] : memref<2x16x128xbf16, #tpu.memory_space<vmem>>, vector<1x16x128xbf16>
    %2 = vector.shape_cast %1 : vector<1x16x128xbf16> to vector<16x128xbf16>
    %cst = arith.constant dense<0.000000e+00> : vector<16x256xf32>
    %3 = tpu.matmul %2, %0, %cst {dimension_numbers = #tpu.dot_dimension_numbers<[1], [0], [0], [1], [0, 0, 1, 1], [], []>} : vector<16x128xbf16>, vector<128x256xbf16>, vector<16x256xf32> -> vector<16x256xf32>
    %c1 = arith.constant 1 : index
    %c0_4 = arith.constant 0 : index
    %c0_5 = arith.constant 0 : index
    %4 = vector.load %arg2[%c1, %c0_4, %c0_5] : memref<2x16x128xbf16, #tpu.memory_space<vmem>>, vector<1x16x128xbf16>
    %5 = vector.shape_cast %4 : vector<1x16x128xbf16> to vector<16x128xbf16>
    %cst_6 = arith.constant dense<0.000000e+00> : vector<16x256xf32>
    %6 = tpu.matmul %5, %0, %cst_6 {dimension_numbers = #tpu.dot_dimension_numbers<[1], [0], [0], [1], [0, 0, 1, 1], [], []>} : vector<16x128xbf16>, vector<128x256xbf16>, vector<16x256xf32> -> vector<16x256xf32>
    %7 = arith.maximumf %3, %6 : vector<16x256xf32>
    %c0_i32 = arith.constant 0 : i32
    %8 = arith.cmpi eq, %arg1, %c0_i32 : i32
    %9 = arith.extui %8 : i1 to i32
    %c0_i32_7 = arith.constant 0 : i32
    %10 = arith.cmpi ne, %9, %c0_i32_7 : i32
    scf.if %10 {
      %c0_11 = arith.constant 0 : index
      %c0_12 = arith.constant 0 : index
      %17 = vector.load %arg6[%c0_11, %c0_12] : memref<16x256xf32, #tpu.memory_space<vmem>>, vector<16x256xf32>
      tpu.vector_store %arg6[%c0_11, %c0_12], %7 {strides = array<i32>} : memref<16x256xf32, #tpu.memory_space<vmem>>, vector<16x256xf32>,
    } else {
    }
    %c0_i32_8 = arith.constant 0 : i32
    %11 = arith.cmpi ne, %arg1, %c0_i32_8 : i32
    %12 = arith.extui %11 : i1 to i32
    %c0_i32_9 = arith.constant 0 : i32
    %13 = arith.cmpi ne, %12, %c0_i32_9 : i32
    scf.if %13 {
      %c0_11 = arith.constant 0 : index
      %c0_12 = arith.constant 0 : index
      %17 = vector.load %arg6[%c0_11, %c0_12] : memref<16x256xf32, #tpu.memory_space<vmem>>, vector<16x256xf32>
      %18 = arith.maximumf %17, %7 : vector<16x256xf32>
      %c0_13 = arith.constant 0 : index
      %c0_14 = arith.constant 0 : index
      %19 = vector.load %arg6[%c0_13, %c0_14] : memref<16x256xf32, #tpu.memory_space<vmem>>, vector<16x256xf32>
      tpu.vector_store %arg6[%c0_13, %c0_14], %18 {strides = array<i32>} : memref<16x256xf32, #tpu.memory_space<vmem>>, vector<16x256xf32>,
    } else {
    }
    %c7_i32 = arith.constant 7 : i32
    %14 = arith.cmpi eq, %arg1, %c7_i32 : i32
    %15 = arith.extui %14 : i1 to i32
    %c0_i32_10 = arith.constant 0 : i32
    %16 = arith.cmpi ne, %15, %c0_i32_10 : i32
    scf.if %16 {
      %c0_11 = arith.constant 0 : index
      %c0_12 = arith.constant 0 : index
      %17 = vector.load %arg6[%c0_11, %c0_12] : memref<16x256xf32, #tpu.memory_space<vmem>>, vector<16x256xf32>
      %c0_13 = arith.constant 0 : index
      %c0_14 = arith.constant 0 : index
      %18 = vector.load %arg4[%c0_13, %c0_14] : memref<1x256xf32, #tpu.memory_space<vmem>>, vector<1x256xf32>
      %19 = vector.broadcast %18 : vector<1x256xf32> to vector<16x256xf32>
      %20 = arith.addf %17, %19 : vector<16x256xf32>
      %21 = arith.truncf %20 : vector<16x256xf32> to vector<16x256xbf16>
      %c0_15 = arith.constant 0 : index
      %c0_16 = arith.constant 0 : index
      %22 = vector.load %arg5[%c0_15, %c0_16] : memref<16x256xbf16, #tpu.memory_space<vmem>>, vector<16x256xbf16>
      tpu.vector_store %arg5[%c0_15, %c0_16], %21 {strides = array<i32>} : memref<16x256xbf16, #tpu.memory_space<vmem>>, vector<16x256xbf16>,
    } else {
    }
    return
  }
  func.func @transform_0(%arg0: i32, %arg1: i32) -> (i32, i32, i32) {
    %c0_i32 = arith.constant 0 : i32
    %c0_i32_0 = arith.constant 0 : i32
    return %arg1, %arg0, %c0_i32 : i32, i32, i32
  }
  func.func @transform_1(%arg0: i32, %arg1: i32) -> (i32, i32) {
    %c0_i32 = arith.constant 0 : i32
    %c0_i32_0 = arith.constant 0 : i32
    %c0_i32_1 = arith.constant 0 : i32
    return %c0_i32, %c0_i32_0 : i32, i32
  }
  func.func @transform_2(%arg0: i32, %arg1: i32) -> (i32, i32) {
    %c0_i32 = arith.constant 0 : i32
    %c0_i32_0 = arith.constant 0 : i32
    %c0_i32_1 = arith.constant 0 : i32
    return %c0_i32, %c0_i32_0 : i32, i32
  }
  func.func @transform_3(%arg0: i32, %arg1: i32) -> (i32, i32) {
    %c0_i32 = arith.constant 0 : i32
    %c0_i32_0 = arith.constant 0 : i32
    return %arg0, %c0_i32 : i32, i32
  }
}

</mosaic_0001>

<bundles_post_ra>
// kernel: custom-call.12
= control target key start
LH: loop header
LB: loop body
LE: loop exit
PB: predicated region body
PF: predicated region fallthrough
CT: control target
= control target key end

     0   :  { %s6_s0 = inlined_call_operand.vmem [shape: f32[2,256], index: 0, kind: output, shape index: {}]  }

// kernel: custom-call.13
= control target key start
LH: loop header
LB: loop body
LE: loop exit
PB: predicated region body
PF: predicated region fallthrough
CT: control target
= control target key end

     0   :  { %s6_s0 = inlined_call_operand.vmem [shape: f32[2,128], index: 0, kind: output, shape index: {}]  }

// kernel: feature_extractor_forward.2
= control target key start
LH: loop header
LB: loop body
LE: loop exit
PB: predicated region body
PF: predicated region fallthrough
CT: control target
= control target key end

     0   :  { %s1011_s12 = smov 0   ;;  %s1013_s13 = smov 0   ;;  %s1131_s0 = inlined_call_operand.vmem [shape: bf16[16,256,64], index: 0, kind: input, shape index: {}]   ;;  %s1132_s1 = inlined_call_operand.vmem [shape: bf16[64,128], index: 1, kind: input, shape index: {}]   ;;  %s1133_s2 = inlined_call_operand.vmem [shape: f32[1,128], index: 2, kind: input, shape index: {}]   ;;  %s1134_s3 = inlined_call_operand.vmem [shape: bf16[256,128], index: 3, kind: output, shape index: {}]  }
   0x1   :  { %s1015_s14 = smov 0   ;;  %s1017_s15 = smov 0  }
   0x2   :  { %s1019_s16 = smov 0   ;;  %s1021_s17 = smov 0  }
   0x3   :  { %s1023_s18 = smov 0  }
   0x4 LB: > { %s22_s19 = sadd.s32 1, %s981_s16  ;;  %s25_s20 = sadd.s32 1, %s985_s17  ;;  %s989_s18 = sphi %s1023_s18, %s13_s18   ;;  %s985_s17 = sphi %s1021_s17, %s1140_s17   ;;  %s981_s16 = sphi %s1019_s16, %s1139_s16   ;;  %s977_s15 = sphi %s1017_s15, %s1138_s15   ;;  %s973_s14 = sphi %s1015_s14, %s1137_s14   ;;  %s969_s13 = sphi %s1013_s13, %s1136_s13   ;;  %s965_s12 = sphi %s1011_s12, %s1135_s12  }
   0x5   : > { %p23_p0 = scmp.ge.s32.totalorder %s22_s19, 8  ;;  %p41_p1 = scmp.ne.s32.totalorder %s969_s13, %s965_s12 }
   0x6   : > { %p42_p2 = scmp.eq.s32.totalorder %s989_s18, 0  ;;  %s34_s24 = sadd.s32 1, %s969_s13 }
   0x7   : > { %s1142_s19 = smov (%p23_p0, %s22_s19), 0  ;;  %s1144_s20 = smov (!%p23_p0, %s25_s20), %s985_s17 }
   0x8   : > { %p43_p3 = por %p42_p2, %p41_p1  ;;  %p27_p4 = scmp.ge.s32.totalorder %s1144_s20, 4 }
   0x9   : > { %s29_s21 = ssub.s32 %s981_s16, %s1142_s19  ;;  %p735_p6 = scmp.ge.s32.totalorder %s989_s18, 32 }
   0xa   : > { %s1146_s20 = smov (%p27_p4, %s1144_s20), 0 }
   0xb   : > { %s30_s22 = ssub.s32 %s985_s17, %s1146_s20  ;;  %141 = sbr.rel (%p735_p6) target bundleno = 27 (0x1b), region = 24 }
   0xc   : > { %s31_s23 = sor.u32 %s30_s22, %s29_s21 }
   0xd   : > { %p32_p5 = scmp.eq.s32.totalorder %s31_s23, 0 }
   0xf   : > { %s1062_s25 = scalar_select %p32_p5, %s969_s13, %s34_s24  }
  0x10   : > { %144 = sbr.rel (!%p43_p3) target bundleno = 27 (0x1b), region = 28  ;;  %s146_s26 = sand.u32 (%p43_p3), 1, %s969_s13  }
  0x11   : > { %s738_s27 = sshll.u32 (%p43_p3), %s985_s17, 3  ;;  %s736_s28 = sshll.u32 (%p43_p3), %s146_s26, 6 }
  0x12   : > { %s787_s29 = sshll.u32 (%p43_p3), %s981_s16, 6  ;;  %s148_s8 = scalar_lea.vmem (%p43_p3), [#allocation3], %s736_s28 }
  0x13   : > { %s152_s30 = sadd.s32 (%p43_p3), %s787_s29, %s738_s27 }
  0x14   : > { %s740_s4 = sshll.u32 (%p43_p3), %s152_s30, 2 }
  0x15   : > { %s154_s7 = scalar_lea.vmem %s1131_s0, %s740_s4 }
  0x16   : > { %v171_v0 = vld [vmem:[%s154_s7] sm:$0xff]   ;;  %v175_v1 = vld [vmem:[%s154_s7 + $0x8] sm:$0xff]   ;;  %v179_v2 = vld [vmem:[%s154_s7 + $0x10] sm:$0xff]  }
  0x17   : > { %172 = vst [vmem:[%s148_s8] sm:$0xff] %v171_v0   ;;  %176 = vst [vmem:[%s148_s8 + $0x8] sm:$0xff] %v175_v1   ;;  %v183_v3 = vld [vmem:[%s154_s7 + $0x18] sm:$0xff]   ;;  %v187_v4 = vld [vmem:[%s154_s7 + $0x80] sm:$0xff]  }
  0x18   : > { %180 = vst [vmem:[%s148_s8 + $0x10] sm:$0xff] %v179_v2   ;;  %v191_v5 = vld [vmem:[%s154_s7 + $0x88] sm:$0xff]   ;;  %184 = vst [vmem:[%s148_s8 + $0x18] sm:$0xff] %v183_v3   ;;  %v195_v6 = vld [vmem:[%s154_s7 + $0x90] sm:$0xff]  }
  0x19   : > { %188 = vst [vmem:[%s148_s8 + $0x20] sm:$0xff] %v187_v4   ;;  %192 = vst [vmem:[%s148_s8 + $0x28] sm:$0xff] %v191_v5   ;;  %v199_v7 = vld [vmem:[%s154_s7 + $0x98] sm:$0xff]  }
  0x1a   : > { %196 = vst [vmem:[%s148_s8 + $0x30] sm:$0xff] %v195_v6   ;;  %200 = vst [vmem:[%s148_s8 + $0x38] sm:$0xff] %v199_v7  }
  0x1b PF: > { %p741_p7 = scmp.ge.s32.totalorder %s989_s18, 1  ;;  %p257_p8 = scmp.lt.s32.totalorder %s989_s18, 33 }
  0x1d   : > { %p258_p9 = pnand %p741_p7, %p257_p8 }
  0x1e   : > { %s743_s9 = sshll.u32 (!%p258_p9), %s977_s15, 3  ;;  %s264_s23 = sand.u32 (!%p258_p9), 1, %s965_s12  }
  0x1f   : > { %261 = sbr.rel (%p258_p9) target bundleno = 294 (0x126), region = 69  ;;  %p290_p10 = scmp.lt.s32.totalorder (!%p258_p9), %s743_s9, 31 }
  0x20   : > { %s742_s15 = sshll.u32 (!%p258_p9), %s264_s23, 6  ;;  %p773_p11 = scmp.ne.s32.totalorder (!%p258_p9), %s973_s14, 0 }
  0x21   : > { %s266_s4 = scalar_lea.vmem (!%p258_p9), [#allocation3], %s742_s15 }
  0x24   : > { %v923_v8 = vld [vmem:[%s1132_s1 + $0x18] sm:$0xff]   ;;  %v924_v9 = vld [vmem:[%s1132_s1 + $0x10] sm:$0xff]   ;;  %s1148_s9 = smov (!%p290_p10, %s743_s9), 31  ;;  %v925_v10 = vld [vmem:[%s1132_s1 + $0x8] sm:$0xff]   ;;  %vm356_vm0 = vcmask 523264  }
  0x25   : > { %835 = vmatprep.subr.bf16.mxu0 %v923_v8  ;;  %851 = vmatprep.subr.bf16.mxu1 %v923_v8  ;;  %s744_s27 = sshll.u32 %s1148_s9, 2  ;;  %v927_v11 = vld [vmem:[%s266_s4] sm:$0xff]   ;;  %v929_v14 = vld [vmem:[%s266_s4 + $0x8] sm:$0xff]   ;;  %v931_v16 = vld [vmem:[%s266_s4 + $0x10] sm:$0xff]  }
  0x26   : > { %836 = vmatpush3.bf16.msra.mxu0 %v923_v8  ;;  %852 = vmatpush3.bf16.msra.mxu1 %v923_v8  ;;  %s1087_s30 = scalar_lea.vmem %s1134_s3, %s744_s27  ;;  %v928_v12 = vld [vmem:[%s266_s4 + $0x20] sm:$0xff]   ;;  %v930_v15 = vld [vmem:[%s266_s4 + $0x28] sm:$0xff]   ;;  %v932_v17 = vld [vmem:[%s266_s4 + $0x30] sm:$0xff]  }
  0x27   : > { %837 = vmatprep.subr.bf16.mxu0 %v924_v9  ;;  %853 = vmatprep.subr.bf16.mxu1 %v924_v9  ;;  %v926_v13 = vld [vmem:[%s1132_s1] sm:$0xff]   ;;  %v933_v18 = vld [vmem:[%s266_s4 + $0x18] sm:$0xff]  }
  0x28   : > { %843 = vmatprep.mubr.msk.bf16.mxu0 %vm356_vm0, %v927_v11  ;;  %859 = vmatprep.mubr.msk.bf16.mxu1 %vm356_vm0, %v928_v12  ;;  %v934_v19 = vld [vmem:[%s266_s4 + $0x38] sm:$0xff]  }
  0x2a   : > { %838 = vmatpush3.bf16.msra.mxu0 %v924_v9  ;;  %854 = vmatpush3.bf16.msra.mxu1 %v924_v9 }
  0x2b   : > { %839 = vmatprep.subr.bf16.mxu0 %v925_v10  ;;  %855 = vmatprep.subr.bf16.mxu1 %v925_v10 }
  0x2e   : > { %840 = vmatpush3.bf16.msra.mxu0 %v925_v10  ;;  %856 = vmatpush3.bf16.msra.mxu1 %v925_v10 }
  0x2f   : > { %841 = vmatprep.subr.bf16.mxu0 %v926_v13  ;;  %857 = vmatprep.subr.bf16.mxu1 %v926_v13 }
  0x32   : > { %842 = vmatpush3.bf16.msra.mxu0 %v926_v13  ;;  %858 = vmatpush3.bf16.msra.mxu1 %v926_v13 }
  0x35   : > { %844 = vmatmul.mubr.msk.bf16.vlgmr.msra.gmra.mxu0 %vm356_vm0, %v929_v14  ;;  %860 = vmatmul.mubr.msk.bf16.vlgmr.msra.gmra.mxu1 %vm356_vm0, %v930_v15 }
  0x36   : > { %847 = vmatprep.mubr.msk.bf16.mxu0 %vm356_vm0, %v931_v16  ;;  %863 = vmatprep.mubr.msk.bf16.mxu1 %vm356_vm0, %v932_v17 }
  0x3d   : > { %848 = vmatmul.mubr.msk.bf16.gmra.mxu0 %vm356_vm0, %v933_v18  ;;  %864 = vmatmul.mubr.msk.bf16.gmra.mxu1 %vm356_vm0, %v934_v19 }
  0xf5   : > { %v845_v20 = vpop.f32.mrf.mxu0  ;;  %v861_v21 = vpop.f32.mrf.mxu1 }
  0xf6   : > { %v542_v22 = vmax.f32 %v845_v20, %v861_v21 }
  0xf7   : > { %v403_v23 = vpop.f32.mrf.mxu0  ;;  %v509_v24 = vpop.f32.mrf.mxu1 }
  0xf8   : > { %v540_v25 = vmax.f32 %v403_v23, %v509_v24 }
  0xf9   : > { %v846_v26 = vpop.f32.mrf.mxu0  ;;  %v862_v27 = vpop.f32.mrf.mxu1 }
  0xfa   : > { %v543_v28 = vmax.f32 %v846_v26, %v862_v27 }
  0xfb   : > { %v406_v29 = vpop.f32.mrf.mxu0  ;;  %v512_v30 = vpop.f32.mrf.mxu1 }
  0xfc   : > { %v541_v31 = vmax.f32 %v406_v29, %v512_v30 }
  0xfd   : > { %v849_v32 = vpop.f32.mrf.mxu0  ;;  %v865_v33 = vpop.f32.mrf.mxu1 }
  0xfe   : > { %v546_v34 = vmax.f32 %v849_v32, %v865_v33 }
  0xff   : > { %v419_v35 = vpop.f32.mrf.mxu0  ;;  %v525_v36 = vpop.f32.mrf.mxu1 }
 0x100   : > { %v544_v37 = vmax.f32 %v419_v35, %v525_v36  ;;  %551 = sbr.rel (%p773_p11) target bundleno = 265 (0x109), region = 77 }
 0x101   : > { %v850_v38 = vpop.f32.mrf.mxu0  ;;  %v866_v39 = vpop.f32.mrf.mxu1 }
 0x102   : > { %v547_v40 = vmax.f32 %v850_v38, %v866_v39 }
 0x103   : > { %v422_v41 = vpop.f32.mrf.mxu0  ;;  %v528_v42 = vpop.f32.mrf.mxu1 }
 0x104   : > { %v545_v43 = vmax.f32 %v422_v41, %v528_v42 }
 0x105   : > { %552 = vst [vmem:[#allocation2 + $0x30] sm:$0xff] %v540_v25  ;;  %553 = vst [vmem:[#allocation2] sm:$0xff] %v541_v31 }
 0x106   : > { %554 = vst [vmem:[#allocation2 + $0x18] sm:$0xff] %v542_v22  ;;  %555 = vst [vmem:[#allocation2 + $0x10] sm:$0xff] %v543_v28 }
 0x107   : > { %556 = vst [vmem:[#allocation2 + $0x8] sm:$0xff] %v544_v37  ;;  %557 = vst [vmem:[#allocation2 + $0x20] sm:$0xff] %v545_v43 }
 0x108   : > { %558 = vst [vmem:[#allocation2 + $0x28] sm:$0xff] %v546_v34  ;;  %559 = vst [vmem:[#allocation2 + $0x38] sm:$0xff] %v547_v40 }
 0x109 PF: > { %p774_p12 = scmp.eq.s32.totalorder %s973_s14, 0 }
 0x10b   : > { %563 = sbr.rel (%p774_p12) target bundleno = 279 (0x117), region = 81 }
 0x110   : > { %v564_v44 = vld [vmem:[#allocation2 + $0x30] sm:$0xff]  ;;  %v565_v45 = vld [vmem:[#allocation2] sm:$0xff]  ;;  %v566_v46 = vld [vmem:[#allocation2 + $0x18] sm:$0xff] }
 0x111   : > { %v572_v47 = vmax.f32 %v564_v44, %v540_v25  ;;  %v573_v48 = vmax.f32 %v565_v45, %v541_v31  ;;  %v574_v49 = vmax.f32 %v566_v46, %v542_v22  ;;  %v567_v50 = vld [vmem:[#allocation2 + $0x10] sm:$0xff]  ;;  %v568_v51 = vld [vmem:[#allocation2 + $0x8] sm:$0xff]  ;;  %v569_v52 = vld [vmem:[#allocation2 + $0x20] sm:$0xff] }
 0x112   : > { %v575_v53 = vmax.f32 %v567_v50, %v543_v28  ;;  %v576_v54 = vmax.f32 %v568_v51, %v544_v37  ;;  %v577_v55 = vmax.f32 %v569_v52, %v545_v43  ;;  %v570_v56 = vld [vmem:[#allocation2 + $0x28] sm:$0xff]  ;;  %v571_v57 = vld [vmem:[#allocation2 + $0x38] sm:$0xff] }
 0x113   : > { %580 = vst [vmem:[#allocation2 + $0x30] sm:$0xff] %v572_v47  ;;  %581 = vst [vmem:[#allocation2] sm:$0xff] %v573_v48  ;;  %v578_v58 = vmax.f32 %v570_v56, %v546_v34  ;;  %v579_v59 = vmax.f32 %v571_v57, %v547_v40 }
 0x114   : > { %582 = vst [vmem:[#allocation2 + $0x18] sm:$0xff] %v574_v49  ;;  %583 = vst [vmem:[#allocation2 + $0x10] sm:$0xff] %v575_v53 }
 0x115   : > { %584 = vst [vmem:[#allocation2 + $0x8] sm:$0xff] %v576_v54  ;;  %585 = vst [vmem:[#allocation2 + $0x20] sm:$0xff] %v577_v55 }
 0x116   : > { %586 = vst [vmem:[#allocation2 + $0x28] sm:$0xff] %v578_v58  ;;  %587 = vst [vmem:[#allocation2 + $0x38] sm:$0xff] %v579_v59 }
 0x117 PF: > { %p775_p13 = scmp.ne.s32.totalorder %s973_s14, 7 }
 0x119   : > { %591 = sbr.rel (%p775_p13) target bundleno = 294 (0x126), region = 85 }
 0x11e   : > { %v592_v60 = vld [vmem:[#allocation2 + $0x30] sm:$0xff]  ;;  %v593_v61 = vld [vmem:[#allocation2] sm:$0xff]  ;;  %v594_v1 = vld [vmem:[#allocation2 + $0x18] sm:$0xff] }
 0x11f   : > { %v776_v62 = vld [vmem:[%s1133_s2] ss:$0 sm:$0xff]  ;;  %v595_v2 = vld [vmem:[#allocation2 + $0x10] sm:$0xff]  ;;  %v596_v3 = vld [vmem:[#allocation2 + $0x8] sm:$0xff] }
 0x120   : > { %v607_v63 = vadd.f32 %v776_v62, %v592_v60  ;;  %v608_v0 = vadd.f32 %v776_v62, %v593_v61  ;;  %v609_v4 = vadd.f32 %v776_v62, %v594_v1  ;;  %v610_v5 = vadd.f32 %v776_v62, %v595_v2  ;;  %v597_v6 = vld [vmem:[#allocation2 + $0x20] sm:$0xff]  ;;  %v598_v8 = vld [vmem:[#allocation2 + $0x28] sm:$0xff]  ;;  %v599_v9 = vld [vmem:[#allocation2 + $0x38] sm:$0xff] }
 0x121   : > { %v611_v7 = vadd.f32 %v776_v62, %v596_v3  ;;  %v612_v11 = vadd.f32 %v776_v62, %v597_v6  ;;  %v613_v12 = vadd.f32 %v776_v62, %v598_v8  ;;  %v614_v13 = vadd.f32 %v776_v62, %v599_v9 }
 0x122   : > { %v799_v10 = vpack.c.bf16 %v608_v0, %v607_v63  ;;  %v804_v14 = vpack.c.bf16 %v610_v5, %v609_v4 }
 0x123   : > { %v809_v15 = vpack.c.bf16 %v612_v11, %v611_v7  ;;  %v814_v16 = vpack.c.bf16 %v614_v13, %v613_v12 }
 0x124   : > { %800 = vst [vmem:[%s1087_s30] sm:$0xff] %v799_v10   ;;  %816 = vst [vmem:[%s1087_s30 + $0x8] sm:$0xff] %v804_v14  }
 0x125   : > { %817 = vst [vmem:[%s1087_s30 + $0x10] sm:$0xff] %v809_v15   ;;  %818 = vst [vmem:[%s1087_s30 + $0x18] sm:$0xff] %v814_v16  }
 0x126 PF: > { %s13_s18 = sadd.s32 1, %s989_s18   ;;  %s1135_s12 = smov %s969_s13 }
 0x127   : > { %p10_p0 = scmp.ge.s32.totalorder %s13_s18, 34   ;;  %s1136_s13 = smov %s1062_s25 }
 0x128   : > { %s1137_s14 = smov %s981_s16  ;;  %s1138_s15 = smov %s985_s17 }
 0x129   : > { %s1139_s16 = smov %s1142_s19  ;;  %s1140_s17 = smov %s1146_s20 }
 0x12a   :  { %12 = sbr.rel (!%p10_p0) target bundleno = 4 (0x4), region = 121 }

// kernel: feature_extractor_forward.3
= control target key start
LH: loop header
LB: loop body
LE: loop exit
PB: predicated region body
PF: predicated region fallthrough
CT: control target
= control target key end

     0   :  { %s799_s12 = smov 0   ;;  %s801_s13 = smov 0   ;;  %s952_s0 = inlined_call_operand.vmem [shape: bf16[16,64,128], index: 0, kind: input, shape index: {}]   ;;  %s953_s1 = inlined_call_operand.vmem [shape: bf16[128,256], index: 1, kind: input, shape index: {}]   ;;  %s954_s2 = inlined_call_operand.vmem [shape: f32[1,256], index: 2, kind: input, shape index: {}]   ;;  %s955_s3 = inlined_call_operand.vmem [shape: bf16[64,256], index: 3, kind: output, shape index: {}]  }
   0x1   :  { %s803_s14 = smov 0   ;;  %s805_s15 = smov 0  }
   0x2   :  { %s807_s16 = smov 0   ;;  %s809_s17 = smov 0  }
   0x3   :  { %s811_s18 = smov 0  }
   0x4 LB: > { %s22_s19 = sadd.s32 1, %s768_s16  ;;  %s25_s20 = sadd.s32 1, %s772_s17  ;;  %s776_s18 = sphi %s811_s18, %s13_s18   ;;  %s772_s17 = sphi %s809_s17, %s961_s17   ;;  %s768_s16 = sphi %s807_s16, %s960_s16   ;;  %s764_s15 = sphi %s805_s15, %s959_s15   ;;  %s760_s14 = sphi %s803_s14, %s958_s14   ;;  %s756_s13 = sphi %s801_s13, %s957_s13   ;;  %s752_s12 = sphi %s799_s12, %s956_s12  }
   0x5   : > { %p23_p0 = scmp.ge.s32.totalorder %s22_s19, 8  ;;  %p41_p1 = scmp.ne.s32.totalorder %s756_s13, %s752_s12 }
   0x6   : > { %p42_p2 = scmp.eq.s32.totalorder %s776_s18, 0  ;;  %s34_s24 = sadd.s32 1, %s756_s13 }
   0x7   : > { %s963_s19 = smov (%p23_p0, %s22_s19), 0  ;;  %s965_s20 = smov (!%p23_p0, %s25_s20), %s772_s17 }
   0x8   : > { %p43_p3 = por %p42_p2, %p41_p1  ;;  %p27_p4 = scmp.ge.s32.totalorder %s965_s20, 4 }
   0x9   : > { %s29_s21 = ssub.s32 %s768_s16, %s963_s19  ;;  %p597_p6 = scmp.ge.s32.totalorder %s776_s18, 32 }
   0xa   : > { %s967_s20 = smov (%p27_p4, %s965_s20), 0 }
   0xb   : > { %s30_s22 = ssub.s32 %s772_s17, %s967_s20  ;;  %141 = sbr.rel (%p597_p6) target bundleno = 25 (0x19), region = 24 }
   0xc   : > { %s31_s23 = sor.u32 %s30_s22, %s29_s21 }
   0xd   : > { %p32_p5 = scmp.eq.s32.totalorder %s31_s23, 0 }
   0xf   : > { %s850_s25 = scalar_select %p32_p5, %s756_s13, %s34_s24  }
  0x10   : > { %144 = sbr.rel (!%p43_p3) target bundleno = 25 (0x19), region = 28  ;;  %s146_s26 = sand.u32 (%p43_p3), 1, %s756_s13  }
  0x11   : > { %s600_s27 = sshll.u32 (%p43_p3), %s772_s17, 1  ;;  %s598_s28 = sshll.u32 (%p43_p3), %s146_s26, 4 }
  0x12   : > { %s635_s29 = sshll.u32 (%p43_p3), %s768_s16, 4  ;;  %s148_s8 = scalar_lea.vmem (%p43_p3), [#allocation3], %s598_s28 }
  0x13   : > { %s152_s30 = sadd.s32 (%p43_p3), %s635_s29, %s600_s27 }
  0x14   : > { %s602_s4 = sshll.u32 (%p43_p3), %s152_s30, 2 }
  0x15   : > { %s154_s7 = scalar_lea.vmem %s952_s0, %s602_s4 }
  0x16   : > { %v171_v0 = vld [vmem:[%s154_s7] sm:$0xff]  }
  0x17   : > { %v175_v1 = vld [vmem:[%s154_s7 + $0x20] sm:$0xff]   ;;  %172 = vst [vmem:[%s148_s8] sm:$0xff] %v171_v0  }
  0x18   : > { %176 = vst [vmem:[%s148_s8 + $0x8] sm:$0xff] %v175_v1  }
  0x19 PF: > { %p603_p7 = scmp.ge.s32.totalorder %s776_s18, 1  ;;  %p209_p8 = scmp.lt.s32.totalorder %s776_s18, 33 }
  0x1b   : > { %p210_p9 = pnand %p603_p7, %p209_p8 }
  0x1c   : > { %s605_s9 = sshll.u32 (!%p210_p9), %s764_s15, 1  ;;  %s216_s26 = sand.u32 (!%p210_p9), 1, %s752_s12  }
  0x1d   : > { %213 = sbr.rel (%p210_p9) target bundleno = 302 (0x12e), region = 69  ;;  %p243_p10 = scmp.lt.s32.totalorder (!%p210_p9), %s605_s9, 7 }
  0x1e   : > { %s883_s12 = sshll.u32 (!%p210_p9), %s216_s26, 4  ;;  %p628_p11 = scmp.ne.s32.totalorder (!%p210_p9), %s760_s14, 0 }
  0x22   : > { %v696_v2 = vld [vmem:[%s953_s1 + $0x74] ss:$8 sps:$4 sm:$0xff]   ;;  %v698_v3 = vld [vmem:[%s953_s1 + $0x70] ss:$8 sps:$4 sm:$0xff]   ;;  %v778_v4 = vmov 0   ;;  %s969_s9 = smov (!%p243_p10, %s605_s9), 7 }
  0x23   : > { %386 = vmatprep.mubr.bf16.mxu0 %v778_v4  ;;  %438 = vmatprep.mubr.bf16.mxu1 %v778_v4  ;;  %v699_v5 = vld [vmem:[%s953_s1 + $0x64] ss:$8 sps:$4 sm:$0xff]   ;;  %v701_v6 = vld [vmem:[%s953_s1 + $0x60] ss:$8 sps:$4 sm:$0xff]   ;;  %v702_v7 = vld [vmem:[%s953_s1 + $0x54] ss:$8 sps:$4 sm:$0xff]  }
  0x24   : > { %354 = vmatprep.subr.bf16.mxu0 %v696_v2  ;;  %406 = vmatprep.subr.bf16.mxu1 %v696_v2  ;;  %s636_s30 = sshll.u32 %s969_s9, 3  ;;  %v704_v8 = vld [vmem:[%s953_s1 + $0x50] ss:$8 sps:$4 sm:$0xff]   ;;  %v705_v9 = vld [vmem:[%s953_s1 + $0x44] ss:$8 sps:$4 sm:$0xff]   ;;  %s218_s9 = scalar_lea.vmem [#allocation3], %s883_s12 }
  0x25   : > { %355 = vmatpush1.bf16.msra.mxu0 %v698_v3  ;;  %407 = vmatpush1.bf16.msra.mxu1 %v698_v3  ;;  %s881_s6 = scalar_lea.vmem %s955_s3, %s636_s30  ;;  %v707_v10 = vld [vmem:[%s953_s1 + $0x40] ss:$8 sps:$4 sm:$0xff]   ;;  %v708_v11 = vld [vmem:[%s953_s1 + $0x34] ss:$8 sps:$4 sm:$0xff]   ;;  %v710_v12 = vld [vmem:[%s953_s1 + $0x30] ss:$8 sps:$4 sm:$0xff]  }
  0x26   : > { %356 = vmatprep.subr.bf16.mxu0 %v699_v5  ;;  %408 = vmatprep.subr.bf16.mxu1 %v699_v5  ;;  %v711_v13 = vld [vmem:[%s953_s1 + $0x24] ss:$8 sps:$4 sm:$0xff]   ;;  %v713_v14 = vld [vmem:[%s953_s1 + $0x20] ss:$8 sps:$4 sm:$0xff]   ;;  %v714_v15 = vld [vmem:[%s953_s1 + $0x14] ss:$8 sps:$4 sm:$0xff]  }
  0x27   : > { %v716_v16 = vld [vmem:[%s953_s1 + $0x10] ss:$8 sps:$4 sm:$0xff]   ;;  %v717_v17 = vld [vmem:[%s953_s1 + $0x4] ss:$8 sps:$4 sm:$0xff]   ;;  %v719_v18 = vld [vmem:[%s953_s1] ss:$8 sps:$4 sm:$0xff]  }
  0x28   : > { %v720_v19 = vld [vmem:[%s218_s9] sm:$0xff]   ;;  %v721_v20 = vld [vmem:[%s218_s9 + $0x8] sm:$0xff]  }
  0x29   : > { %357 = vmatpush1.bf16.msra.mxu0 %v701_v6  ;;  %409 = vmatpush1.bf16.msra.mxu1 %v701_v6 }
  0x2a   : > { %358 = vmatprep.subr.bf16.mxu0 %v702_v7  ;;  %410 = vmatprep.subr.bf16.mxu1 %v702_v7 }
  0x2d   : > { %359 = vmatpush1.bf16.msra.mxu0 %v704_v8  ;;  %411 = vmatpush1.bf16.msra.mxu1 %v704_v8 }
  0x2e   : > { %360 = vmatprep.subr.bf16.mxu0 %v705_v9  ;;  %412 = vmatprep.subr.bf16.mxu1 %v705_v9 }
  0x31   : > { %361 = vmatpush1.bf16.msra.mxu0 %v707_v10  ;;  %413 = vmatpush1.bf16.msra.mxu1 %v707_v10 }
  0x32   : > { %362 = vmatprep.subr.bf16.mxu0 %v708_v11  ;;  %414 = vmatprep.subr.bf16.mxu1 %v708_v11 }
  0x35   : > { %363 = vmatpush1.bf16.msra.mxu0 %v710_v12  ;;  %415 = vmatpush1.bf16.msra.mxu1 %v710_v12 }
  0x36   : > { %364 = vmatprep.subr.bf16.mxu0 %v711_v13  ;;  %416 = vmatprep.subr.bf16.mxu1 %v711_v13 }
  0x39   : > { %365 = vmatpush1.bf16.msra.mxu0 %v713_v14  ;;  %417 = vmatpush1.bf16.msra.mxu1 %v713_v14 }
  0x3a   : > { %366 = vmatprep.subr.bf16.mxu0 %v714_v15  ;;  %418 = vmatprep.subr.bf16.mxu1 %v714_v15 }
  0x3d   : > { %367 = vmatpush1.bf16.msra.mxu0 %v716_v16  ;;  %419 = vmatpush1.bf16.msra.mxu1 %v716_v16 }
  0x3e   : > { %368 = vmatprep.subr.bf16.mxu0 %v717_v17  ;;  %420 = vmatprep.subr.bf16.mxu1 %v717_v17 }
  0x41   : > { %369 = vmatpush1.bf16.msra.mxu0 %v719_v18  ;;  %421 = vmatpush1.bf16.msra.mxu1 %v719_v18 }
  0x44   : > { %387 = vmatmul.mubr.bf16.vlgmr.msra.gmra.mxu0 %v720_v19  ;;  %439 = vmatmul.mubr.bf16.vlgmr.msra.gmra.mxu1 %v721_v20 }
 0x104   : > { %v388_v21 = vpop.f32.mrf.mxu0  ;;  %v440_v22 = vpop.f32.mrf.mxu1 }
 0x105   : > { %v449_v23 = vmax.f32 %v388_v21, %v440_v22 }
 0x106   : > { %v390_v24 = vpop.f32.mrf.mxu0  ;;  %v442_v25 = vpop.f32.mrf.mxu1 }
 0x107   : > { %v450_v26 = vmax.f32 %v390_v24, %v442_v25  ;;  %456 = sbr.rel (%p628_p11) target bundleno = 270 (0x10e), region = 77 }
 0x108   : > { %v392_v27 = vpop.f32.mrf.mxu0  ;;  %v444_v28 = vpop.f32.mrf.mxu1 }
 0x109   : > { %v451_v29 = vmax.f32 %v392_v27, %v444_v28 }
 0x10a   : > { %v394_v30 = vpop.f32.mrf.mxu0  ;;  %v446_v31 = vpop.f32.mrf.mxu1 }
 0x10b   : > { %v452_v32 = vmax.f32 %v394_v30, %v446_v31 }
 0x10c   : > { %457 = vst [vmem:[#allocation2 + $0x10] sm:$0xff] %v449_v23  ;;  %458 = vst [vmem:[#allocation2] sm:$0xff] %v450_v26 }
 0x10d   : > { %459 = vst [vmem:[#allocation2 + $0x18] sm:$0xff] %v451_v29  ;;  %460 = vst [vmem:[#allocation2 + $0x8] sm:$0xff] %v452_v32 }
 0x10e PF: > { %p629_p12 = scmp.eq.s32.totalorder %s760_s14, 0 }
 0x110   : > { %464 = sbr.rel (%p629_p12) target bundleno = 282 (0x11a), region = 81 }
 0x115   : > { %v465_v33 = vld [vmem:[#allocation2 + $0x10] sm:$0xff]  ;;  %v466_v34 = vld [vmem:[#allocation2] sm:$0xff]  ;;  %v467_v35 = vld [vmem:[#allocation2 + $0x18] sm:$0xff] }
 0x116   : > { %v469_v36 = vmax.f32 %v465_v33, %v449_v23  ;;  %v470_v37 = vmax.f32 %v466_v34, %v450_v26  ;;  %v471_v38 = vmax.f32 %v467_v35, %v451_v29  ;;  %v468_v39 = vld [vmem:[#allocation2 + $0x8] sm:$0xff] }
 0x117   : > { %v472_v40 = vmax.f32 %v468_v39, %v452_v32 }
 0x118   : > { %473 = vst [vmem:[#allocation2 + $0x10] sm:$0xff] %v469_v36  ;;  %474 = vst [vmem:[#allocation2] sm:$0xff] %v470_v37 }
 0x119   : > { %475 = vst [vmem:[#allocation2 + $0x18] sm:$0xff] %v471_v38  ;;  %476 = vst [vmem:[#allocation2 + $0x8] sm:$0xff] %v472_v40 }
 0x11a PF: > { %p630_p13 = scmp.ne.s32.totalorder %s760_s14, 7 }
 0x11c   : > { %480 = sbr.rel (%p630_p13) target bundleno = 302 (0x12e), region = 85 }
 0x121   : > { %v487_v41 = vlaneseq  ;;  %v485_v43 = vld [vmem:[%s954_s2] sm:$0x3]  ;;  %v481_v44 = vld [vmem:[#allocation2 + $0x10] sm:$0xff]  ;;  %v483_v48 = vld [vmem:[#allocation2 + $0x18] sm:$0xff] }
 0x122   : > { %v482_v47 = vld [vmem:[#allocation2] sm:$0xff]  ;;  %v484_v49 = vld [vmem:[#allocation2 + $0x8] sm:$0xff] }
 0x123   : > { %v488_v42 = vshrl.u32 %v487_v41, 7 }
 0x125   : > { %v489_v45 = vsub.s32 0, %v488_v42  ;;  %v493_v46 = vsub.s32 1, %v488_v42 }
 0x127   : > { %v490_v50 = vrot.slane %v485_v43, %v489_v45  ;;  %v494_v51 = vrot.slane %v485_v43, %v493_v46 }
 0x129   : > { %v497_v52 = vadd.f32 %v490_v50, %v481_v44  ;;  %v498_v53 = vadd.f32 %v494_v51, %v482_v47  ;;  %v499_v54 = vadd.f32 %v490_v50, %v483_v48  ;;  %v500_v55 = vadd.f32 %v494_v51, %v484_v49 }
 0x12b   : > { %v637_v56 = vpack.c.bf16 %v498_v53, %v497_v52  ;;  %v638_v57 = vpack.c.bf16 %v500_v55, %v499_v54 }
 0x12d   : > { %513 = vst [vmem:[%s881_s6] sm:$0xff] %v637_v56  ;;  %514 = vst [vmem:[%s881_s6 + $0x8] sm:$0xff] %v638_v57 }
 0x12e PF: > { %s13_s18 = sadd.s32 1, %s776_s18   ;;  %s956_s12 = smov %s756_s13 }
 0x12f   : > { %p10_p0 = scmp.ge.s32.totalorder %s13_s18, 34   ;;  %s957_s13 = smov %s850_s25 }
 0x130   : > { %s958_s14 = smov %s768_s16  ;;  %s959_s15 = smov %s772_s17 }
 0x131   : > { %s960_s16 = smov %s963_s19  ;;  %s961_s17 = smov %s967_s20 }
 0x132   :  { %12 = sbr.rel (!%p10_p0) target bundleno = 4 (0x4), region = 121 }

</bundles_post_ra>
